<compile_context>
chip_gen: v6e
topology: v6e:2x2x1
jax: 0.10.0
libtpu: 0.0.40
codegen_flags: <defaults>
</compile_context>

<pallas_src>
import functools

import jax
import jax.numpy as jnp
from jax.experimental import pallas as pl
from jax.experimental.pallas import tpu as pltpu


# ---------------------------------------------------------------------------
# Kernels
# ---------------------------------------------------------------------------

def _se_rowwise_kernel(x_ref, w1_ref, w2_ref, o_ref, *, inv_l):
    """Whole SE block for one batch row. x_ref/o_ref: (1, C, L)."""
    x = x_ref[0]                                                     # (C, L), native dtype
    # squeeze: one lane-axis reduce with f32 accumulation, one 1/L multiply
    y = jnp.sum(x, axis=-1, keepdims=True, dtype=jnp.float32) * inv_l    # (C, 1) f32
    # excite: fc1 -> relu -> fc2 -> sigmoid. Weights stay in native dtype;
    # the tiny pooled vector is cast down instead (native MXU input mode).
    h = jnp.maximum(
        jnp.dot(w1_ref[...], y.astype(w1_ref.dtype),
                preferred_element_type=jnp.float32), 0.0)            # (C//r, 1) f32
    s = jax.nn.sigmoid(
        jnp.dot(w2_ref[...], h.astype(w2_ref.dtype),
                preferred_element_type=jnp.float32))                 # (C, 1) f32
    # scale: lane-broadcast the per-channel gate over L in the native dtype
    o_ref[0] = x * s.astype(x.dtype)


def _se_pool_gate_kernel(x_ref, w1_ref, w2_ref, gate_ref, acc_ref, *,
                         inv_l, true_l, tl, mask_tail):
    """Phase 1: accumulate per-channel sums over L tiles; MLP once per row."""
    l = pl.program_id(1)

    @pl.when(l == 0)
    def _init():
        acc_ref[...] = jnp.zeros_like(acc_ref)

    x = x_ref[0]                                                     # (C, TL), native dtype
    if mask_tail:
        # Ragged tail: contents of the OOB part of the last (partial) input
        # block are undefined -> zero them before the reduction.
        lane = jax.lax.broadcasted_iota(jnp.int32, x.shape, dimension=1)
        x = jnp.where(lane + l * tl < true_l, x, jnp.zeros_like(x))
    acc_ref[...] += jnp.sum(x, axis=-1, keepdims=True, dtype=jnp.float32)

    @pl.when(l == pl.num_programs(1) - 1)
    def _finalize():
        y = acc_ref[...] * inv_l                                     # (C, 1) mean, f32
        h = jnp.maximum(
            jnp.dot(w1_ref[...], y.astype(w1_ref.dtype),
                    preferred_element_type=jnp.float32), 0.0)        # (C//r, 1)
        s = jax.nn.sigmoid(
            jnp.dot(w2_ref[...], h.astype(w2_ref.dtype),
                    preferred_element_type=jnp.float32))             # (C, 1)
        gate_ref[0] = s.astype(gate_ref.dtype)


def _se_scale_kernel(x_ref, gate_ref, o_ref):
    """Phase 2: out = x * gate, native dtype, (1, C, 1) lane-broadcast."""
    o_ref[...] = x_ref[...] * gate_ref[...]


# ---------------------------------------------------------------------------
# Wrapper
# ---------------------------------------------------------------------------

def _vmem_capacity_bytes():
    """Physical VMEM per core (128 MiB v5e/v6e, 64 MiB v7x); safe fallback."""
    try:
        return int(pltpu.get_tpu_info().vmem_capacity_bytes)
    except Exception:
        return 64 * 1024 * 1024   # conservative: works on every generation


def se_block(x, w1, w2, *, vmem_budget_bytes=None, l_tile_cap=2048,
             force_two_phase=False):
    """SE block forward. x: (B, C, L); w1: (C//r, C); w2: (C, C//r)."""
    B, C, L = x.shape
    Cr = w1.shape[0]
    assert w1.shape == (Cr, C) and w2.shape == (C, Cr)
    inv_l = 1.0 / L

    x_item = jnp.dtype(x.dtype).itemsize
    w_item = jnp.dtype(w1.dtype).itemsize

    # --- hardware-derived VMEM planning -----------------------------------
    vmem_cap = _vmem_capacity_bytes()
    if vmem_budget_bytes is None:
        # ~96 MiB on 128-MiB chips (v5e/v6e), ~48 MiB on 64-MiB v7x cores.
        vmem_budget_bytes = min(vmem_cap - (16 << 20), (vmem_cap * 3) // 4)
    vmem_budget_bytes = int(vmem_budget_bytes)
    vmem_limit = int(min(vmem_cap, vmem_budget_bytes + (8 << 20)))

    # --- fast-path eligibility: dtype-aware actual footprint ---------------
    row_bytes = C * L * x_item                       # one (1, C, L) block
    weight_bytes = 2 * Cr * C * w_item               # w1 + w2 (single copy)
    # 2 double-buffered input + 2 output row blocks (4x) + one row of slack
    # for the x*s temporary, double-buffered weights, small f32 temporaries.
    fast_bytes = 5 * row_bytes + 2 * weight_bytes + 64 * C * 4

    # On small-VMEM (v7x-like, 2 TC) chips with too few batch rows to feed
    # both cores, prefer the two-phase path whose L axis is 'parallel'.
    prefer_two_phase = (vmem_cap <= (80 << 20)) and (B < 2) and (L >= 256)

    if (not force_two_phase and not prefer_two_phase
            and fast_bytes <= vmem_budget_bytes):
        return pl.pallas_call(
            functools.partial(_se_rowwise_kernel, inv_l=inv_l),
            out_shape=jax.ShapeDtypeStruct((B, C, L), x.dtype),
            grid_spec=pltpu.PrefetchScalarGridSpec(
                num_scalar_prefetch=0,
                grid=(B,),
                in_specs=[
                    pl.BlockSpec((1, C, L), lambda b: (b, 0, 0)),
                    pl.BlockSpec((Cr, C), lambda b: (0, 0)),   # grid-invariant, resident
                    pl.BlockSpec((C, Cr), lambda b: (0, 0)),   # grid-invariant, resident
                ],
                out_specs=pl.BlockSpec((1, C, L), lambda b: (b, 0, 0)),
            ),
            compiler_params=pltpu.CompilerParams(
                dimension_semantics=("parallel",),
                vmem_limit_bytes=vmem_limit),
        )(x, w1, w2)

    # --- general path: two-phase reduce -> scale, lane-dense 128-mult tiles --
    # phase 2 is the binding phase: 2 input + 2 output blocks in native dtype.
    cap_lanes = max(128, (vmem_budget_bytes // (4 * C * x_item)) // 128 * 128)
    tl_cand = int(min(l_tile_cap, cap_lanes))
    if tl_cand >= L:
        tl, n_l, ragged = L, 1, False        # full-extent block, no masking
    else:
        tl = tl_cand                         # multiple of 128
        n_l = pl.cdiv(L, tl)
        ragged = (L % tl) != 0               # mask the ragged tail in-kernel

    gate = pl.pallas_call(
        functools.partial(_se_pool_gate_kernel, inv_l=inv_l, true_l=L,
                          tl=tl, mask_tail=ragged),
        out_shape=jax.ShapeDtypeStruct((B, C, 1), x.dtype),
        grid_spec=pltpu.PrefetchScalarGridSpec(
            num_scalar_prefetch=0,
            grid=(B, n_l),                                   # reduction (L) axis last
            in_specs=[
                pl.BlockSpec((1, C, tl), lambda b, l: (b, 0, l)),
                pl.BlockSpec((Cr, C), lambda b, l: (0, 0)),
                pl.BlockSpec((C, Cr), lambda b, l: (0, 0)),
            ],
            out_specs=pl.BlockSpec((1, C, 1), lambda b, l: (b, 0, 0)),  # resident per row
            scratch_shapes=[pltpu.VMEM((C, 1), jnp.float32)],
        ),
        compiler_params=pltpu.CompilerParams(
            dimension_semantics=("parallel", "arbitrary"),
            vmem_limit_bytes=vmem_limit),
    )(x, w1, w2)

    # Phase 2: no padding/slicing of x; Pallas masks the partial last output
    # block, and garbage in the OOB part of the last input block is never
    # written back.
    out = pl.pallas_call(
        _se_scale_kernel,
        out_shape=jax.ShapeDtypeStruct((B, C, L), x.dtype),
        grid_spec=pltpu.PrefetchScalarGridSpec(
            num_scalar_prefetch=0,
            grid=(B, n_l),
            in_specs=[
                pl.BlockSpec((1, C, tl), lambda b, l: (b, 0, l)),
                pl.BlockSpec((1, C, 1), lambda b, l: (b, 0, 0)),
            ],
            out_specs=pl.BlockSpec((1, C, tl), lambda b, l: (b, 0, l)),
        ),
        compiler_params=pltpu.CompilerParams(
            dimension_semantics=("parallel", "parallel"),
            vmem_limit_bytes=vmem_limit),
    )(x, gate)

    return out


# ---------------------------------------------------------------------------
# Reference & demo
# ---------------------------------------------------------------------------

def se_block_ref(x, w1, w2):
    y = x.mean(axis=2)
    y = jnp.maximum(y @ w1.T, 0.0)
    y = jax.nn.sigmoid(y @ w2.T)
    return x * y[:, :, None]


if __name__ == "__main__":
    B, C, L = 2, 8, 16
    reduction = 2
    Cr = C // reduction

    key = jax.random.PRNGKey(0)
    kx, k1, k2 = jax.random.split(key, 3)
    x = jax.random.normal(kx, (B, C, L), dtype=jnp.float32)
    # deterministic "Linear(bias=False)" weights, native PyTorch layout
    w1 = jax.random.normal(k1, (Cr, C), dtype=jnp.float32) * 0.1
    w2 = jax.random.normal(k2, (C, Cr), dtype=jnp.float32) * 0.1

    ref = se_block_ref(x, w1, w2)

    # fast path (row-resident, grid over batch)
    out_fast = jax.block_until_ready(se_block(x, w1, w2))
    assert out_fast.shape == (B, C, L)
    assert jnp.allclose(out_fast, ref, atol=1e-4, rtol=1e-4), "fast path mismatch"

    # general two-phase tiled path (forced, single full-extent L tile)
    out_tiled = jax.block_until_ready(se_block(x, w1, w2, force_two_phase=True))
    assert out_tiled.shape == (B, C, L)
    assert jnp.allclose(out_tiled, ref, atol=1e-4, rtol=1e-4), "two-phase mismatch"

    # ragged-L two-phase path: exercises the in-kernel tail mask (no jnp.pad,
    # no output slice) with a 128-wide tile over L=200 -> partial last block.
    L2 = 200
    x2 = jax.random.normal(kx, (B, C, L2), dtype=jnp.float32)
    ref2 = se_block_ref(x2, w1, w2)
    out_ragged = jax.block_until_ready(
        se_block(x2, w1, w2, force_two_phase=True, l_tile_cap=128))
    assert out_ragged.shape == (B, C, L2)
    assert jnp.allclose(out_ragged, ref2, atol=1e-4, rtol=1e-4), "ragged mismatch"

    print("KERNEL_OK")
</pallas_src>

<mosaic_0001>
module attributes {stable_mosaic.version = 11 : i64} {
  func.func @_se_rowwise_kernel(%arg0: i32, %arg1: memref<1x8x16xf32, #tpu.memory_space<vmem>>, %arg2: memref<4x8xf32, #tpu.memory_space<vmem>>, %arg3: memref<8x4xf32, #tpu.memory_space<vmem>>, %arg4: memref<1x8x16xf32, #tpu.memory_space<vmem>>) attributes {dimension_semantics = [#tpu.dimension_semantics<parallel>], iteration_bounds = array<i64: 2>, scalar_prefetch = 0 : i64, scratch_operands = 0 : i64, tpu.core_type = #tpu.core_type<tc>, window_params = [{transform_indices = @transform_0, window_bounds = array<i64: 1, 8, 16>}, {pipeline_mode = #tpu.pipeline_mode<synchronous>, transform_indices = @transform_1, window_bounds = array<i64: 4, 8>}, {pipeline_mode = #tpu.pipeline_mode<synchronous>, transform_indices = @transform_2, window_bounds = array<i64: 8, 4>}, {transform_indices = @transform_3, window_bounds = array<i64: 1, 8, 16>}]} {
    %c0 = arith.constant 0 : index
    %c0_0 = arith.constant 0 : index
    %c0_1 = arith.constant 0 : index
    %0 = vector.load %arg1[%c0, %c0_0, %c0_1] : memref<1x8x16xf32, #tpu.memory_space<vmem>>, vector<1x8x16xf32>
    %1 = vector.shape_cast %0 : vector<1x8x16xf32> to vector<8x16xf32>
    %cst = arith.constant dense<0.000000e+00> : vector<8xf32>
    %2 = vector.multi_reduction <add>, %1, %cst [1] : vector<8x16xf32> to vector<8xf32>
    %3 = vector.shape_cast %2 : vector<8xf32> to vector<8x1xf32>
    %cst_2 = arith.constant 6.250000e-02 : f32
    %4 = vector.broadcast %cst_2 : f32 to vector<8x1xf32>
    %5 = arith.mulf %3, %4 : vector<8x1xf32>
    %c0_3 = arith.constant 0 : index
    %c0_4 = arith.constant 0 : index
    %6 = vector.load %arg2[%c0_3, %c0_4] : memref<4x8xf32, #tpu.memory_space<vmem>>, vector<4x8xf32>
    %cst_5 = arith.constant dense<0.000000e+00> : vector<4x1xf32>
    %7 = tpu.matmul %6, %5, %cst_5 {dimension_numbers = #tpu.dot_dimension_numbers<[1], [0], [0], [1], [0, 0, 1, 1], [], []>} : vector<4x8xf32>, vector<8x1xf32>, vector<4x1xf32> -> vector<4x1xf32>
    %cst_6 = arith.constant 0.000000e+00 : f32
    %8 = vector.broadcast %cst_6 : f32 to vector<4x1xf32>
    %9 = arith.maximumf %7, %8 : vector<4x1xf32>
    %c0_7 = arith.constant 0 : index
    %c0_8 = arith.constant 0 : index
    %10 = vector.load %arg3[%c0_7, %c0_8] : memref<8x4xf32, #tpu.memory_space<vmem>>, vector<8x4xf32>
    %cst_9 = arith.constant dense<0.000000e+00> : vector<8x1xf32>
    %11 = tpu.matmul %10, %9, %cst_9 {dimension_numbers = #tpu.dot_dimension_numbers<[1], [0], [0], [1], [0, 0, 1, 1], [], []>} : vector<8x4xf32>, vector<4x1xf32>, vector<8x1xf32> -> vector<8x1xf32>
    %12 = arith.negf %11 : vector<8x1xf32>
    %13 = math.exp %12 : vector<8x1xf32>
    %cst_10 = arith.constant 1.000000e+00 : f32
    %14 = vector.broadcast %cst_10 : f32 to vector<8x1xf32>
    %15 = arith.addf %14, %13 : vector<8x1xf32>
    %16 = arith.divf %14, %15 : vector<8x1xf32>
    %17 = vector.broadcast %16 : vector<8x1xf32> to vector<8x16xf32>
    %18 = arith.mulf %1, %17 : vector<8x16xf32>
    %c0_11 = arith.constant 0 : index
    %c0_12 = arith.constant 0 : index
    %c0_13 = arith.constant 0 : index
    %19 = vector.load %arg4[%c0_11, %c0_12, %c0_13] : memref<1x8x16xf32, #tpu.memory_space<vmem>>, vector<1x8x16xf32>
    %20 = vector.shape_cast %19 : vector<1x8x16xf32> to vector<8x16xf32>
    %21 = vector.shape_cast %18 : vector<8x16xf32> to vector<1x8x16xf32>
    tpu.vector_store %arg4[%c0_11, %c0_12, %c0_13], %21 {strides = array<i32>} : memref<1x8x16xf32, #tpu.memory_space<vmem>>, vector<1x8x16xf32>,
    return
  }
  func.func @transform_0(%arg0: i32) -> (i32, i32, i32) {
    %c0_i32 = arith.constant 0 : i32
    %c0_i32_0 = arith.constant 0 : i32
    %c0_i32_1 = arith.constant 0 : i32
    return %arg0, %c0_i32, %c0_i32_0 : i32, i32, i32
  }
  func.func @transform_1(%arg0: i32) -> (i32, i32) {
    %c0_i32 = arith.constant 0 : i32
    %c0_i32_0 = arith.constant 0 : i32
    %c0_i32_1 = arith.constant 0 : i32
    return %c0_i32, %c0_i32_0 : i32, i32
  }
  func.func @transform_2(%arg0: i32) -> (i32, i32) {
    %c0_i32 = arith.constant 0 : i32
    %c0_i32_0 = arith.constant 0 : i32
    %c0_i32_1 = arith.constant 0 : i32
    return %c0_i32, %c0_i32_0 : i32, i32
  }
  func.func @transform_3(%arg0: i32) -> (i32, i32, i32) {
    %c0_i32 = arith.constant 0 : i32
    %c0_i32_0 = arith.constant 0 : i32
    %c0_i32_1 = arith.constant 0 : i32
    return %arg0, %c0_i32, %c0_i32_0 : i32, i32, i32
  }
}

</mosaic_0001>

<bundles_post_ra>
// kernel: tpu_custom_call.1
= control target key start
LH: loop header
LB: loop body
LE: loop exit
PB: predicated region body
PF: predicated region fallthrough
CT: control target
= control target key end

     0   :  { %8 = vsyncpa [#allocation3], 0  ;;  %s800_s0 = inlined_call_operand.hbm [shape: f32[2,8,16], index: 0, kind: input, shape index: {}]   ;;  %s801_s1 = inlined_call_operand.vmem [shape: f32[4,8], index: 1, kind: input, shape index: {}]   ;;  %s802_s2 = inlined_call_operand.vmem [shape: f32[8,4], index: 2, kind: input, shape index: {}]   ;;  %s803_s3 = inlined_call_operand.hbm [shape: f32[2,8,16], index: 3, kind: output, shape index: {}]  }
   0x1   :  { %10 = vsyncpa [#allocation3 + $0x1], 0 }
   0x2   :  { %11 = vsyncpa [#allocation4], 0 }
   0x3   :  { %13 = vsyncpa [#allocation4 + $0x1], 0  ;;  %s647_s12 = smov 0   ;;  %s649_s13 = smov 0  }
   0x4   :  { %s651_s14 = smov 0   ;;  %s653_s15 = smov 0  }
   0x5 LB: > { %s668_s16 = sadd.s32 4294967295, %s620_s15   ;;  %s444_s17 = sadd.s32 4294967294, %s620_s15   ;;  %s620_s15 = sphi %s653_s15, %s820_s15   ;;  %s616_s14 = sphi %s651_s14, %s819_s14   ;;  %s612_s13 = sphi %s649_s13, %s818_s13   ;;  %s608_s12 = sphi %s647_s12, %s817_s12  }
   0x6   : > { %s672_s18 = sadd.s32 1, %s620_s15   ;;  %s26_s19 = sadd.s32 1, %s616_s14 }
   0x7   : > { %s23_s20 = ssub.s32 %s620_s15, %s672_s18  ;;  %p33_p0 = scmp.ne.s32.totalorder %s616_s14, %s612_s13 }
   0x8   : > { %p24_p1 = scmp.eq.s32.totalorder %s23_s20, 0  ;;  %p34_p2 = scmp.eq.s32.totalorder %s620_s15, 0 }
   0x9   : > { %p39_p3 = scmp.ne.s32.totalorder %s612_s13, %s608_s12  ;;  %p40_p4 = scmp.eq.s32.totalorder %s668_s16, 0 }
   0xa   : > { %s684_s21 = scalar_select %p24_p1, %s616_s14, %s26_s19  }
   0xb   : > { %p686_p5 = por %p34_p2, %p33_p0  ;;  %p690_p6 = por %p40_p4, %p39_p3 }
   0xc   : > { %p105_p7 = scmp.eq.s32.totalorder %s668_s16, 1  ;;  %p111_p8 = scmp.eq.s32.totalorder %s444_s17, 1 }
   0xd   : > { %s807_s23 = scalar_select %p690_p6, 1, 0 }
   0xe   : > { %p486_p10 = scmp.lt.s32.totalorder %s620_s15, 2  ;;  %p697_p11 = por %p105_p7, %p33_p0 }
   0xf   : > { %p701_p12 = por %p111_p8, %p39_p3  ;;  %s137_s26 = sand.u32 1, %s616_s14  }
  0x10   : > { %s808_s24 = scalar_select %p697_p11, 1, 0 }
  0x11   : > { %s809_s25 = scalar_select %p701_p12, 1, 0 }
  0x12   : > { %s448_s27 = sshll.u32 %s620_s15, 7  ;;  %s447_s28 = sshll.u32 %s137_s26, 3 }
  0x13   : > { %s710_s4 = scalar_lea.hbm %s800_s0, %s448_s27  ;;  %s141_s5 = scalar_lea.vmem [#allocation2], %s447_s28 }
  0x14   : > { %s148_s6 = sshll.u32 %s141_s5, 4  ;;  %p714_p13 = pnand %p486_p10, %p686_p5  ;;  %s718_s6 = int_to_ptr.vmem [resolvable:$true] %s148_s6 }
  0x15   : > { %s138_s8 = scalar_lea.sflag [#allocation3], %s137_s26  ;;  %s528_s9 = scalar_lea.hbm %s710_s4, 128 }
  0x16   : > { %p529_p2 = scmp.ne.s32.totalorder %s710_s4, %s528_s9  ;;  %p530_p3 = pneg %p714_p13 }
  0x17   : > { %s533_s17 = scalar_lea.hbm %s800_s0, 256  ;;  %p534_p5 = scmp.lt.s32.totalorder %s710_s4, %s800_s0 }
  0x18   : > { %p531_p4 = pnand %p530_p3, %p529_p2  ;;  %p535_p8 = scmp.lt.s32.totalorder %s533_s17, %s528_s9 }
  0x1a   : > { %p532_p7 = pneg %p531_p4  ;;  %p536_p10 = por %p535_p8, %p534_p5 }
  0x1c   : > { %p537_p9 = pnand %p536_p10, %p532_p7 }
  0x1e   : > { %540 = shalt.err (!%p537_p9)
}
  0x1f   : > { %s541_s22 = scalar_lea.vmem %s718_s6, 128  ;;  %s622_s26 = smov [#allocation2]  }
  0x20   : > { %p542_p0 = scmp.ne.s32.totalorder %s718_s6, %s541_s22  ;;  %s546_s27 = sshll.u32 %s622_s26, 4  ;;  %s547_s27 = int_to_ptr.vmem [resolvable:$false] %s546_s27 }
  0x21   : > { %s548_s28 = scalar_lea.vmem %s547_s27, 256  ;;  %p549_p4 = scmp.lt.s32.totalorder %s718_s6, %s547_s27 }
  0x22   : > { %p544_p1 = pnand %p542_p0, %p530_p3  ;;  %p550_p12 = scmp.lt.s32.totalorder %s548_s28, %s541_s22 }
  0x24   : > { %p545_p2 = pneg %p544_p1  ;;  %p551_p11 = por %p550_p12, %p549_p4 }
  0x26   : > { %p552_p6 = pnand %p551_p11, %p545_p2 }
  0x28   : > { %555 = shalt.err (!%p552_p6)
}
  0x29   : > { %481 = dma.hbm_to_vmem [thread:$0]  (!%p714_p13), %s710_s4, 128, %s718_s6, %s138_s8  }
  0x2a   : > { %p811_p9 = scmp.lt.s32.totalorder %s620_s15, 3  ;;  %p812_p7 = scmp.ge.s32.totalorder %s620_s15, 1 }
  0x2c   : > { %p154_p0 = pnand %p812_p7, %p811_p9 }
  0x2d   : > { %s745_s29 = sand.u32 (!%p154_p0), 1, %s612_s13   ;;  %p813_p6 = scmp.ne.s32.totalorder (!%p154_p0), %s807_s23, 0 }
  0x2e   : > { %157 = sbr.rel (%p154_p0) target bundleno = 755 (0x2f3), region = 32  ;;  %s450_s30 = sshll.u32 (!%p154_p0), %s745_s29, 3 }
  0x2f   : > { %s160_s5 = scalar_lea.sflag (!%p154_p0), [#allocation3], %s745_s29  ;;  %s163_s7 = scalar_lea.vmem (!%p154_p0), [#allocation2], %s450_s30 }
  0x33   : > { %599 = dma.done.wait (%p813_p6), %s160_s5, 128  }
  0x34   : > { %601 = vsyncadd (%p813_p6), %s160_s5, 4294967168  ;;  %vm187_vm0 = vcmask 130048   ;;  %v186_v0 = vld [vmem:[%s163_s7] sm:$0xff]  ;;  %v623_v2 = vmov 0.0   ;;  %vm624_vm1 = vmmov 0   ;;  %vm193_vm2 = vcmask 64512  }
  0x35   : > { %v188_v1 = vsel %vm187_vm0, %v186_v0, 0.0  ;;  %464 = vmatprep.subr.mxu0 %v623_v2  ;;  %469 = vmatprep.subr.mxu1 %v623_v2  ;;  %v192_v5 = vld [vmem:[%s801_s1] sm:$0xf]  ;;  %vm273_vm3 = vcmask 1043456   ;;  %vm269_vm4 = vcmask 31744   ;;  %v625_v10 = vmov 0  }
  0x36   : > { %189 = vadd.xlane.f32.xlu0 %v188_v1  ;;  %466 = vmatprep.mubr.msk.f32.mxu0 %vm624_vm1, %v623_v2  ;;  %v268_v8 = vld [vmem:[%s802_s2] sm:$0xff]  ;;  %s457_s9 = sshll.u32 %s668_s16, 7  ;;  %s185_s10 = scalar_lea.vmem [#allocation5], %s450_s30 }
  0x37   : > { %471 = vmatprep.mubr.msk.f32.mxu1 %vm624_vm1, %v623_v2  ;;  %523 = vset.pattern.permute.xlu0 %v625_v10  ;;  %s374_s11 = sshll.u32 %s185_s10, 4  ;;  %s372_s20 = scalar_lea.hbm %s803_s3, %s457_s9  ;;  %s375_s11 = int_to_ptr.vmem [resolvable:$true] %s374_s11 }
  0x38   : > { %s361_s22 = scalar_lea.sflag [#allocation4], %s745_s29  ;;  %s556_s26 = scalar_lea.vmem %s375_s11, 128 }
  0x39   : > { %p557_p11 = scmp.ne.s32.totalorder %s375_s11, %s556_s26  ;;  %p814_p12 = scmp.ne.s32.totalorder %s808_s24, 0 }
  0x3a   : > { %s626_s27 = smov [#allocation5]  }
  0x3b   : > { %p558_p13 = pnand %p557_p11, %p814_p12  ;;  %s560_s16 = sshll.u32 %s626_s27, 4  ;;  %s561_s16 = int_to_ptr.vmem [resolvable:$false] %s560_s16 }
  0x3c   : > { %s562_s28 = scalar_lea.vmem %s561_s16, 256  ;;  %p563_p3 = scmp.lt.s32.totalorder %s375_s11, %s561_s16 }
  0x3d   : > { %p559_p1 = pneg %p558_p13  ;;  %p564_p5 = scmp.lt.s32.totalorder %s562_s28, %s556_s26 }
  0x3f   : > { %p565_p8 = por %p564_p5, %p563_p3 }
  0x41   : > { %p566_p10 = pnand %p565_p8, %p559_p1 }
  0xbf   : > { %v190_v3 = vpop.xlane.xlu0 %189 }
  0xc0   : > { %v191_v4 = vmul.f32 0.0625, %v190_v3 }
  0xc2   : > { %465 = vmatpush3.msra.mxu0 %v191_v4 }
  0xc3   : > { %467 = vmatmul.mubr.msk.f32.vlgmr.msra.gmra.mxu0 %vm193_vm2, %v192_v5 }
 0x183   : > { %v263_v6 = vpop.f32.mrf.mxu0 }
 0x184   : > { %v267_v7 = vmax.f32 %v263_v6, 0.0 }
 0x185   : > { %v468_v9 = vpop.f32.mrf.mxu0 }
 0x186   : > { %470 = vmatpush3.msk.msra.mxu1 %vm273_vm3, %v267_v7 }
 0x187   : > { %472 = vmatmul.mubr.msk.f32.vlgmr.msra.gmra.mxu1 %vm269_vm4, %v268_v8 }
 0x247   : > { %v343_v11 = vpop.f32.mrf.mxu1 }
 0x248   : > { %v455_v12 = vmul.f32 -1.442695, %v343_v11 }
 0x249   : > { %v473_v13 = vpop.f32.mrf.mxu1 }
 0x24a   : > { %524 = vpow2.f32 %v455_v12 }
 0x257   : > { %v525_v14 = vpop.eup %524 }
 0x258   : > { %v350_v15 = vadd.f32 1.0, %v525_v14 }
 0x25a   : > { %526 = vrcp.f32 %v350_v15 }
 0x267   : > { %v527_v16 = vpop.eup %526 }
 0x268   : > { %355 = vperm.xlu0 %523, %v527_v16  }
 0x2e3   : > { %v356_v17 = vpop.permute.xlu0 %355 }
 0x2e4   : > { %v358_v18 = vmul.f32 %v356_v17, %v186_v0 }
 0x2e6   : > { %359 = vst.msk [vmem:[%s185_s10] sm:$0xff] %vm187_vm0, %v358_v18 }
 0x2e7   : > { %569 = shalt.err (!%p566_p10)
}
 0x2e8   : > { %s570_s30 = scalar_lea.hbm %s372_s20, 128  ;;  %s574_s7 = scalar_lea.hbm %s803_s3, 256 }
 0x2e9   : > { %p571_p2 = scmp.ne.s32.totalorder %s372_s20, %s570_s30  ;;  %p575_p7 = scmp.lt.s32.totalorder %s372_s20, %s803_s3 }
 0x2ea   : > { %p576_p0 = scmp.lt.s32.totalorder %s574_s7, %s570_s30 }
 0x2eb   : > { %p572_p4 = pnand %p571_p2, %p814_p12 }
 0x2ec   : > { %p577_p6 = por %p576_p0, %p575_p7 }
 0x2ed   : > { %p573_p9 = pneg %p572_p4 }
 0x2ef   : > { %p578_p11 = pnand %p577_p6, %p573_p9 }
 0x2f1   : > { %581 = shalt.err (!%p578_p11)
}
 0x2f2   : > { %476 = dma.vmem_to_hbm [thread:$0]  (%p814_p12), %s375_s11, 128, %s372_s20, %s361_s22  }
 0x2f3 PF: > { %s386_s23 = sand.u32 1, %s608_s12   ;;  %p815_p13 = scmp.ne.s32.totalorder %s809_s25, 0 }
 0x2f4   : > { %p816_p1 = scmp.ge.s32.totalorder %s620_s15, 2  ;;  %s387_s8 = scalar_lea.sflag [#allocation4], %s386_s23 }
 0x2f6   : > { %p483_p3 = pnand %p816_p1, %p815_p13 }
 0x2f8   : > { %p484_p5 = pneg %p483_p3 }
 0x2fa   : > { %603 = dma.done.wait (%p484_p5), %s387_s8, 128  }
 0x2fb   : > { %605 = vsyncadd (%p484_p5), %s387_s8, 4294967168  ;;  %p16_p8 = scmp.ge.s32.totalorder %s672_s18, 4   ;;  %s817_s12 = smov %s612_s13 }
 0x2fc   : > { %s818_s13 = smov %s616_s14  ;;  %s819_s14 = smov %s684_s21 }
 0x2fd   : > { %s820_s15 = smov %s672_s18  ;;  %18 = sbr.rel (!%p16_p8) target bundleno = 5 (0x5), region = 77 }
 0x302   :  { %392 = vsyncpa [#allocation3], 1 }
 0x303   :  { %394 = vsyncpa [#allocation3 + $0x1], 1 }
 0x304   :  { %395 = vsyncpa [#allocation4], 1 }
 0x305   :  { %397 = vsyncpa [#allocation4 + $0x1], 1 }

</bundles_post_ra>
